<compile_context>
chip_gen: v7x
topology: tpu7x:2x2x1
jax: 0.10.0
libtpu: 0.0.40
codegen_flags: <defaults>
</compile_context>

<pallas_src>
import functools

import jax
import jax.numpy as jnp
from jax.experimental import pallas as pl
from jax.experimental.pallas import tpu as pltpu

BN_EPS = 1e-5


def _round_up(x, m):
    return ((x + m - 1) // m) * m


# ---------------------------------------------------------------------------
# downsampling: depthwise Conv2d(C, C, kernel_size=2, stride=2, groups=C)+bias
# Trivially mem-bound with C on lanes -> plain XLA (fused into the following
# ConvBlock's wrapper glue), no pallas_call (per perf review).
# ---------------------------------------------------------------------------
def downsample_conv2x2(x_nhwc, w, b):
    """x_nhwc: (N, H, W, C) f32, w: (C, 2, 2), b: (C,). Returns (N, H//2, W//2, C)."""
    x00 = x_nhwc[:, 0::2, 0::2, :]
    x01 = x_nhwc[:, 0::2, 1::2, :]
    x10 = x_nhwc[:, 1::2, 0::2, :]
    x11 = x_nhwc[:, 1::2, 1::2, :]
    return (x00 * w[:, 0, 0] + x01 * w[:, 0, 1]
            + x10 * w[:, 1, 0] + x11 * w[:, 1, 1] + b)


# ---------------------------------------------------------------------------
# ConvBlock: 3x3 reflect-pad conv (no bias) -> BatchNorm2d (batch stats) -> ReLU
# ---------------------------------------------------------------------------
def conv_block_forward(x_nhwc, weight_oihw, gamma, beta,
                       compute_dtype=jnp.bfloat16, out_dtype=jnp.float32):
    """x_nhwc: (N,H,W,Cin); weight: (Cout,Cin,3,3). Returns (N,H,W,Cout) out_dtype."""
    N, H, W, Cin = x_nhwc.shape
    Cout, Cin_w, K, _ = weight_oihw.shape
    assert K == 3 and Cin_w == Cin
    Hp, Wp = H + 2, W + 2
    CK = K * K * Cin                     # folded contraction width (9*Cin)
    p_total = H * Wp                     # output rows in padded-flat indexing
    p_tile = min(512, _round_up(p_total, 8))
    p_pad = _round_up(p_total, p_tile)   # cdiv-style grid with padded tail
    n_tiles = p_pad // p_tile

    # --- wrapper glue (one fused XLA pass): reflect pad -> flatten ->
    #     lane-packed im2col (tap-major, channel-minor) -> pad rows to p_pad ---
    # TODO(synk): for a chain of ConvBlocks, fuse block i's BN/ReLU output
    # directly into block i+1's im2col (write halo'd rows from pass 2) to
    # remove this per-block XLA glue pass entirely.
    xp = jnp.pad(x_nhwc.astype(compute_dtype),
                 ((0, 0), (1, 1), (1, 1), (0, 0)), mode="reflect")
    x_flat = xp.reshape(N, Hp * Wp, Cin)
    x_flat = jnp.pad(x_flat, ((0, 0), (0, 2), (0, 0)))   # deepest tap read = Hp*Wp+1
    offs = tuple(kh * Wp + kw for kh in range(K) for kw in range(K))
    im2col = jnp.concatenate([x_flat[:, o:o + p_total, :] for o in offs], axis=-1)
    im2col = jnp.pad(im2col, ((0, 0), (0, p_pad - p_total), (0, 0)))

    # folded weights: (kh, kw, Cin, Cout) -> (9*Cin, Cout), matches im2col lanes
    w2d = jnp.transpose(weight_oihw, (2, 3, 1, 0)).reshape(CK, Cout)
    w2d = w2d.astype(compute_dtype)

    # 1/0 mask of valid rows: image column < W and row < p_total (tail padding).
    # NOTE: invalid rows still flow through pass 2 / ReLU and are sliced off in
    # the wrapper; the mask only keeps them out of the BN statistics.
    p_idx = jnp.arange(p_pad, dtype=jnp.int32)
    valid = ((p_idx % Wp) < W) & (p_idx < p_total)
    mask = valid.astype(jnp.float32).reshape(p_pad, 1)

    # --- pass 1: single K-folded conv matmul per tile + BN partial sums,
    #     accumulated in a VMEM-resident (2, Cout) output across row tiles ---
    def _pass1_kernel(x_ref, w_ref, m_ref, stats_ref):
        conv = jnp.dot(x_ref[...], w_ref[...],
                       preferred_element_type=jnp.float32)     # (p_tile, Cout)
        masked = conv * m_ref[...]                              # zero invalid rows
        ones = jnp.ones((1, p_tile), jnp.float32)
        s1 = jnp.dot(ones, masked, preferred_element_type=jnp.float32)
        s2 = jnp.dot(ones, masked * masked, preferred_element_type=jnp.float32)
        tile_stats = jnp.concatenate([s1, s2], axis=0)          # (2, Cout)

        @pl.when(pl.program_id(1) == 0)
        def _():
            stats_ref[...] = tile_stats

        @pl.when(pl.program_id(1) > 0)
        def _():
            stats_ref[...] = stats_ref[...] + tile_stats

    stats = pl.pallas_call(
        _pass1_kernel,
        out_shape=jax.ShapeDtypeStruct((N, 2, Cout), jnp.float32),
        grid_spec=pltpu.PrefetchScalarGridSpec(
            num_scalar_prefetch=0,
            grid=(N, n_tiles),
            in_specs=[
                pl.BlockSpec((None, p_tile, CK), lambda n, j: (n, j, 0)),
                pl.BlockSpec((CK, Cout), lambda n, j: (0, 0)),
                pl.BlockSpec((p_tile, 1), lambda n, j: (j, 0)),
            ],
            out_specs=pl.BlockSpec((None, 2, Cout), lambda n, j: (n, 0, 0)),
        ),
        compiler_params=pltpu.CompilerParams(
            # row-tile axis carries the stats accumulator -> "arbitrary";
            # sample axis is parallel (megacore).  TODO(synk): for N==1 on v7x,
            # split the stats reduction so the row-tile axis can be parallel.
            dimension_semantics=("parallel", "arbitrary")),
    )(im2col, w2d, mask)

    # --- tiny cross-sample reduction + BN scale/shift precompute (XLA glue) ---
    count = jnp.float32(N * H * W)
    s1 = jnp.sum(stats[:, 0, :], axis=0)
    s2 = jnp.sum(stats[:, 1, :], axis=0)
    mean = s1 / count
    var = jnp.maximum(s2 / count - mean * mean, 0.0)            # biased variance
    scale = gamma.astype(jnp.float32) * jax.lax.rsqrt(var + BN_EPS)
    shift = beta.astype(jnp.float32) - mean * scale
    scale2 = scale.reshape(1, Cout)
    shift2 = shift.reshape(1, Cout)

    # --- pass 2: recompute conv from the small bf16 im2col (no f32 conv
    #     intermediate round-trips HBM), apply relu(conv*scale+shift) ---
    def _pass2_kernel(x_ref, w_ref, sc_ref, sh_ref, o_ref):
        conv = jnp.dot(x_ref[...], w_ref[...],
                       preferred_element_type=jnp.float32)
        y = jnp.maximum(conv * sc_ref[...] + sh_ref[...], 0.0)  # f32 BN/ReLU math
        o_ref[...] = y.astype(o_ref.dtype)

    y_pf = pl.pallas_call(
        _pass2_kernel,
        out_shape=jax.ShapeDtypeStruct((N, p_pad, Cout), out_dtype),
        grid_spec=pltpu.PrefetchScalarGridSpec(
            num_scalar_prefetch=0,
            grid=(N, n_tiles),
            in_specs=[
                pl.BlockSpec((None, p_tile, CK), lambda n, j: (n, j, 0)),
                pl.BlockSpec((CK, Cout), lambda n, j: (0, 0)),
                pl.BlockSpec((1, Cout), lambda n, j: (0, 0)),
                pl.BlockSpec((1, Cout), lambda n, j: (0, 0)),
            ],
            out_specs=pl.BlockSpec((None, p_tile, Cout), lambda n, j: (n, j, 0)),
        ),
        compiler_params=pltpu.CompilerParams(
            dimension_semantics=("parallel", "parallel")),
    )(im2col, w2d, scale2, shift2)

    # drop the tail-pad rows and the Wp-pad columns
    y = y_pf[:, :p_total, :].reshape(N, H, Wp, Cout)[:, :, :W, :]
    return y


# ---------------------------------------------------------------------------
# Down forward: depthwise 2x2/s2 conv -> ConvBlock chain (all NHWC internally)
# ---------------------------------------------------------------------------
@functools.partial(jax.jit, static_argnames=("compute_dtype",))
def down_forward(x_nchw, down_w, down_b, conv_blocks,
                 compute_dtype=jnp.bfloat16):
    # TODO(synk): BatchNorm running_mean/running_var are not tracked/updated;
    # this is the training-mode forward only (batch statistics).
    x = jnp.transpose(x_nchw, (0, 2, 3, 1))       # NCHW -> NHWC, once
    x = downsample_conv2x2(x, down_w, down_b)     # plain XLA, fused with glue
    k = len(conv_blocks)
    for i, (w, g, b) in enumerate(conv_blocks):
        # intermediate blocks stored in compute_dtype; final block in f32
        out_dtype = jnp.float32 if i == k - 1 else compute_dtype
        x = conv_block_forward(x, w, g, b,
                               compute_dtype=compute_dtype, out_dtype=out_dtype)
    return jnp.transpose(x, (0, 3, 1, 2))         # back to NCHW, once


# ---------------------------------------------------------------------------
# pure-JAX reference (same semantics) for correctness checks
# ---------------------------------------------------------------------------
def _ref_conv_block(x_nchw, w, gamma, beta):
    xp = jnp.pad(x_nchw, ((0, 0), (0, 0), (1, 1), (1, 1)), mode="reflect")
    conv = jax.lax.conv_general_dilated(
        xp, w, window_strides=(1, 1), padding="VALID",
        dimension_numbers=("NCHW", "OIHW", "NCHW"),
        precision=jax.lax.Precision.HIGHEST)
    mean = jnp.mean(conv, axis=(0, 2, 3), keepdims=True)
    var = jnp.mean((conv - mean) ** 2, axis=(0, 2, 3), keepdims=True)
    y = (conv - mean) * jax.lax.rsqrt(var + BN_EPS)
    y = y * gamma.reshape(1, -1, 1, 1) + beta.reshape(1, -1, 1, 1)
    return jnp.maximum(y, 0.0)


def _ref_down_forward(x_nchw, down_w, down_b, conv_blocks):
    c = x_nchw.shape[1]
    y = jax.lax.conv_general_dilated(
        x_nchw, down_w.reshape(c, 1, 2, 2), window_strides=(2, 2),
        padding="VALID", dimension_numbers=("NCHW", "OIHW", "NCHW"),
        feature_group_count=c, precision=jax.lax.Precision.HIGHEST)
    y = y + down_b.reshape(1, -1, 1, 1)
    for (w, g, b) in conv_blocks:
        y = _ref_conv_block(y, w, g, b)
    return y


if __name__ == "__main__":
    # Down(in_channels=4, out_channels=8, convs=2), input (2, 4, 16, 16).
    N, Cin, Cout, H, W = 2, 4, 8, 16, 16
    convs = 2

    key = jax.random.PRNGKey(0)
    ks = jax.random.split(key, 8)
    x = jax.random.normal(ks[0], (N, Cin, H, W), dtype=jnp.float32)

    # downsampling: depthwise Conv2d(Cin, Cin, k=2, s=2, groups=Cin) with bias
    down_w = 0.3 * jax.random.normal(ks[1], (Cin, 2, 2), dtype=jnp.float32)
    down_b = 0.1 * jax.random.normal(ks[2], (Cin,), dtype=jnp.float32)

    # ConvBlock(Cin, Cout, 3) then ConvBlock(Cout, Cout, 3)
    w1 = 0.2 * jax.random.normal(ks[3], (Cout, Cin, 3, 3), dtype=jnp.float32)
    g1 = 1.0 + 0.1 * jax.random.normal(ks[4], (Cout,), dtype=jnp.float32)
    b1 = 0.1 * jax.random.normal(ks[5], (Cout,), dtype=jnp.float32)
    w2 = 0.2 * jax.random.normal(ks[6], (Cout, Cout, 3, 3), dtype=jnp.float32)
    g2 = jnp.ones((Cout,), dtype=jnp.float32)     # BatchNorm2d default init
    b2 = jnp.zeros((Cout,), dtype=jnp.float32)
    blocks = [(w1, g1, b1), (w2, g2, b2)]
    assert len(blocks) == convs

    ref = _ref_down_forward(x, down_w, down_b, blocks)

    # f32 path: tight algorithmic check against the pure-JAX reference
    out_f32 = down_forward(x, down_w, down_b, blocks,
                           compute_dtype=jnp.float32)
    out_f32 = jax.block_until_ready(out_f32)
    assert out_f32.shape == (N, Cout, H // 2, W // 2)
    assert jnp.allclose(out_f32, ref, atol=2e-2, rtol=2e-2), "f32 mismatch"

    # bf16 matmul-input / bf16 inter-block path (default fast path): sanity check
    out_bf16 = down_forward(x, down_w, down_b, blocks,
                            compute_dtype=jnp.bfloat16)
    out_bf16 = jax.block_until_ready(out_bf16)
    assert out_bf16.shape == (N, Cout, H // 2, W // 2)
    assert jnp.allclose(out_bf16, ref, atol=1e-1, rtol=1e-1), "bf16 mismatch"

    print("KERNEL_OK")
</pallas_src>

<mosaic_0001>
module attributes {stable_mosaic.version = 11 : i64} {
  func.func @_pass1_kernel(%arg0: i32, %arg1: i32, %arg2: memref<1x80x36xf32, #tpu.memory_space<vmem>>, %arg3: memref<36x8xf32, #tpu.memory_space<vmem>>, %arg4: memref<80x1xf32, #tpu.memory_space<vmem>>, %arg5: memref<1x2x8xf32, #tpu.memory_space<vmem>>) attributes {dimension_semantics = [#tpu.dimension_semantics<parallel>, #tpu.dimension_semantics<arbitrary>], iteration_bounds = array<i64: 2, 1>, scalar_prefetch = 0 : i64, scratch_operands = 0 : i64, tpu.core_type = #tpu.core_type<tc>, window_params = [{transform_indices = @transform_0, window_bounds = array<i64: 1, 80, 36>}, {pipeline_mode = #tpu.pipeline_mode<synchronous>, transform_indices = @transform_1, window_bounds = array<i64: 36, 8>}, {transform_indices = @transform_2, window_bounds = array<i64: 80, 1>}, {transform_indices = @transform_3, window_bounds = array<i64: 1, 2, 8>}]} {
    %c0 = arith.constant 0 : index
    %c0_0 = arith.constant 0 : index
    %c0_1 = arith.constant 0 : index
    %0 = vector.load %arg2[%c0, %c0_0, %c0_1] : memref<1x80x36xf32, #tpu.memory_space<vmem>>, vector<1x80x36xf32>
    %1 = vector.shape_cast %0 : vector<1x80x36xf32> to vector<80x36xf32>
    %c0_2 = arith.constant 0 : index
    %c0_3 = arith.constant 0 : index
    %2 = vector.load %arg3[%c0_2, %c0_3] : memref<36x8xf32, #tpu.memory_space<vmem>>, vector<36x8xf32>
    %cst = arith.constant dense<0.000000e+00> : vector<80x8xf32>
    %3 = tpu.matmul %1, %2, %cst {dimension_numbers = #tpu.dot_dimension_numbers<[1], [0], [0], [1], [0, 0, 1, 1], [], []>} : vector<80x36xf32>, vector<36x8xf32>, vector<80x8xf32> -> vector<80x8xf32>
    %c0_4 = arith.constant 0 : index
    %c0_5 = arith.constant 0 : index
    %4 = vector.load %arg4[%c0_4, %c0_5] : memref<80x1xf32, #tpu.memory_space<vmem>>, vector<80x1xf32>
    %5 = vector.broadcast %4 : vector<80x1xf32> to vector<80x8xf32>
    %6 = arith.mulf %3, %5 : vector<80x8xf32>
    %cst_6 = arith.constant 1.000000e+00 : f32
    %7 = vector.broadcast %cst_6 : f32 to vector<1x80xf32>
    %cst_7 = arith.constant dense<0.000000e+00> : vector<1x8xf32>
    %8 = tpu.matmul %7, %6, %cst_7 {dimension_numbers = #tpu.dot_dimension_numbers<[1], [0], [0], [1], [0, 0, 1, 1], [], []>} : vector<1x80xf32>, vector<80x8xf32>, vector<1x8xf32> -> vector<1x8xf32>
    %9 = arith.mulf %6, %6 : vector<80x8xf32>
    %cst_8 = arith.constant dense<0.000000e+00> : vector<1x8xf32>
    %10 = tpu.matmul %7, %9, %cst_8 {dimension_numbers = #tpu.dot_dimension_numbers<[1], [0], [0], [1], [0, 0, 1, 1], [], []>} : vector<1x80xf32>, vector<80x8xf32>, vector<1x8xf32> -> vector<1x8xf32>
    %11 = tpu.concatenate %8, %10 in 0 : vector<1x8xf32>, vector<1x8xf32> -> vector<2x8xf32>
    %c0_i32 = arith.constant 0 : i32
    %12 = arith.cmpi eq, %arg1, %c0_i32 : i32
    %13 = arith.extui %12 : i1 to i32
    %c0_i32_9 = arith.constant 0 : i32
    %14 = arith.cmpi ne, %13, %c0_i32_9 : i32
    scf.if %14 {
      %c0_12 = arith.constant 0 : index
      %c0_13 = arith.constant 0 : index
      %c0_14 = arith.constant 0 : index
      %18 = vector.load %arg5[%c0_12, %c0_13, %c0_14] : memref<1x2x8xf32, #tpu.memory_space<vmem>>, vector<1x2x8xf32>
      %19 = vector.shape_cast %18 : vector<1x2x8xf32> to vector<2x8xf32>
      %20 = vector.shape_cast %11 : vector<2x8xf32> to vector<1x2x8xf32>
      tpu.vector_store %arg5[%c0_12, %c0_13, %c0_14], %20 {strides = array<i32>} : memref<1x2x8xf32, #tpu.memory_space<vmem>>, vector<1x2x8xf32>,
    } else {
    }
    %c0_i32_10 = arith.constant 0 : i32
    %15 = arith.cmpi sgt, %arg1, %c0_i32_10 : i32
    %16 = arith.extui %15 : i1 to i32
    %c0_i32_11 = arith.constant 0 : i32
    %17 = arith.cmpi ne, %16, %c0_i32_11 : i32
    scf.if %17 {
      %c0_12 = arith.constant 0 : index
      %c0_13 = arith.constant 0 : index
      %c0_14 = arith.constant 0 : index
      %18 = vector.load %arg5[%c0_12, %c0_13, %c0_14] : memref<1x2x8xf32, #tpu.memory_space<vmem>>, vector<1x2x8xf32>
      %19 = vector.shape_cast %18 : vector<1x2x8xf32> to vector<2x8xf32>
      %20 = arith.addf %19, %11 : vector<2x8xf32>
      %c0_15 = arith.constant 0 : index
      %c0_16 = arith.constant 0 : index
      %c0_17 = arith.constant 0 : index
      %21 = vector.load %arg5[%c0_15, %c0_16, %c0_17] : memref<1x2x8xf32, #tpu.memory_space<vmem>>, vector<1x2x8xf32>
      %22 = vector.shape_cast %21 : vector<1x2x8xf32> to vector<2x8xf32>
      %23 = vector.shape_cast %20 : vector<2x8xf32> to vector<1x2x8xf32>
      tpu.vector_store %arg5[%c0_15, %c0_16, %c0_17], %23 {strides = array<i32>} : memref<1x2x8xf32, #tpu.memory_space<vmem>>, vector<1x2x8xf32>,
    } else {
    }
    return
  }
  func.func @transform_0(%arg0: i32, %arg1: i32) -> (i32, i32, i32) {
    %c0_i32 = arith.constant 0 : i32
    %c0_i32_0 = arith.constant 0 : i32
    return %arg0, %arg1, %c0_i32 : i32, i32, i32
  }
  func.func @transform_1(%arg0: i32, %arg1: i32) -> (i32, i32) {
    %c0_i32 = arith.constant 0 : i32
    %c0_i32_0 = arith.constant 0 : i32
    %c0_i32_1 = arith.constant 0 : i32
    return %c0_i32, %c0_i32_0 : i32, i32
  }
  func.func @transform_2(%arg0: i32, %arg1: i32) -> (i32, i32) {
    %c0_i32 = arith.constant 0 : i32
    %c0_i32_0 = arith.constant 0 : i32
    return %arg1, %c0_i32 : i32, i32
  }
  func.func @transform_3(%arg0: i32, %arg1: i32) -> (i32, i32, i32) {
    %c0_i32 = arith.constant 0 : i32
    %c0_i32_0 = arith.constant 0 : i32
    %c0_i32_1 = arith.constant 0 : i32
    return %arg0, %c0_i32, %c0_i32_0 : i32, i32, i32
  }
}

module attributes {stable_mosaic.version = 11 : i64} {
  func.func @_pass2_kernel(%arg0: i32, %arg1: i32, %arg2: memref<1x80x36xf32, #tpu.memory_space<vmem>>, %arg3: memref<36x8xf32, #tpu.memory_space<vmem>>, %arg4: memref<1x8xf32, #tpu.memory_space<vmem>>, %arg5: memref<1x8xf32, #tpu.memory_space<vmem>>, %arg6: memref<1x80x8xf32, #tpu.memory_space<vmem>>) attributes {dimension_semantics = [#tpu.dimension_semantics<parallel>, #tpu.dimension_semantics<parallel>], iteration_bounds = array<i64: 2, 1>, scalar_prefetch = 0 : i64, scratch_operands = 0 : i64, tpu.core_type = #tpu.core_type<tc>, window_params = [{transform_indices = @transform_0, window_bounds = array<i64: 1, 80, 36>}, {pipeline_mode = #tpu.pipeline_mode<synchronous>, transform_indices = @transform_1, window_bounds = array<i64: 36, 8>}, {pipeline_mode = #tpu.pipeline_mode<synchronous>, transform_indices = @transform_2, window_bounds = array<i64: 1, 8>}, {pipeline_mode = #tpu.pipeline_mode<synchronous>, transform_indices = @transform_3, window_bounds = array<i64: 1, 8>}, {transform_indices = @transform_4, window_bounds = array<i64: 1, 80, 8>}]} {
    %c0 = arith.constant 0 : index
    %c0_0 = arith.constant 0 : index
    %c0_1 = arith.constant 0 : index
    %0 = vector.load %arg2[%c0, %c0_0, %c0_1] : memref<1x80x36xf32, #tpu.memory_space<vmem>>, vector<1x80x36xf32>
    %1 = vector.shape_cast %0 : vector<1x80x36xf32> to vector<80x36xf32>
    %c0_2 = arith.constant 0 : index
    %c0_3 = arith.constant 0 : index
    %2 = vector.load %arg3[%c0_2, %c0_3] : memref<36x8xf32, #tpu.memory_space<vmem>>, vector<36x8xf32>
    %cst = arith.constant dense<0.000000e+00> : vector<80x8xf32>
    %3 = tpu.matmul %1, %2, %cst {dimension_numbers = #tpu.dot_dimension_numbers<[1], [0], [0], [1], [0, 0, 1, 1], [], []>} : vector<80x36xf32>, vector<36x8xf32>, vector<80x8xf32> -> vector<80x8xf32>
    %c0_4 = arith.constant 0 : index
    %c0_5 = arith.constant 0 : index
    %4 = vector.load %arg4[%c0_4, %c0_5] : memref<1x8xf32, #tpu.memory_space<vmem>>, vector<1x8xf32>
    %5 = vector.broadcast %4 : vector<1x8xf32> to vector<80x8xf32>
    %6 = arith.mulf %3, %5 : vector<80x8xf32>
    %c0_6 = arith.constant 0 : index
    %c0_7 = arith.constant 0 : index
    %7 = vector.load %arg5[%c0_6, %c0_7] : memref<1x8xf32, #tpu.memory_space<vmem>>, vector<1x8xf32>
    %8 = vector.broadcast %7 : vector<1x8xf32> to vector<80x8xf32>
    %9 = arith.addf %6, %8 : vector<80x8xf32>
    %cst_8 = arith.constant 0.000000e+00 : f32
    %10 = vector.broadcast %cst_8 : f32 to vector<80x8xf32>
    %11 = arith.maximumf %9, %10 : vector<80x8xf32>
    %c0_9 = arith.constant 0 : index
    %c0_10 = arith.constant 0 : index
    %c0_11 = arith.constant 0 : index
    %12 = vector.load %arg6[%c0_9, %c0_10, %c0_11] : memref<1x80x8xf32, #tpu.memory_space<vmem>>, vector<1x80x8xf32>
    %13 = vector.shape_cast %12 : vector<1x80x8xf32> to vector<80x8xf32>
    %14 = vector.shape_cast %11 : vector<80x8xf32> to vector<1x80x8xf32>
    tpu.vector_store %arg6[%c0_9, %c0_10, %c0_11], %14 {strides = array<i32>} : memref<1x80x8xf32, #tpu.memory_space<vmem>>, vector<1x80x8xf32>,
    return
  }
  func.func @transform_0(%arg0: i32, %arg1: i32) -> (i32, i32, i32) {
    %c0_i32 = arith.constant 0 : i32
    %c0_i32_0 = arith.constant 0 : i32
    return %arg0, %arg1, %c0_i32 : i32, i32, i32
  }
  func.func @transform_1(%arg0: i32, %arg1: i32) -> (i32, i32) {
    %c0_i32 = arith.constant 0 : i32
    %c0_i32_0 = arith.constant 0 : i32
    %c0_i32_1 = arith.constant 0 : i32
    return %c0_i32, %c0_i32_0 : i32, i32
  }
  func.func @transform_2(%arg0: i32, %arg1: i32) -> (i32, i32) {
    %c0_i32 = arith.constant 0 : i32
    %c0_i32_0 = arith.constant 0 : i32
    %c0_i32_1 = arith.constant 0 : i32
    return %c0_i32, %c0_i32_0 : i32, i32
  }
  func.func @transform_3(%arg0: i32, %arg1: i32) -> (i32, i32) {
    %c0_i32 = arith.constant 0 : i32
    %c0_i32_0 = arith.constant 0 : i32
    %c0_i32_1 = arith.constant 0 : i32
    return %c0_i32, %c0_i32_0 : i32, i32
  }
  func.func @transform_4(%arg0: i32, %arg1: i32) -> (i32, i32, i32) {
    %c0_i32 = arith.constant 0 : i32
    %c0_i32_0 = arith.constant 0 : i32
    return %arg0, %arg1, %c0_i32 : i32, i32, i32
  }
}

module attributes {stable_mosaic.version = 11 : i64} {
  func.func @_pass1_kernel(%arg0: i32, %arg1: i32, %arg2: memref<1x80x72xf32, #tpu.memory_space<vmem>>, %arg3: memref<72x8xf32, #tpu.memory_space<vmem>>, %arg4: memref<80x1xf32, #tpu.memory_space<vmem>>, %arg5: memref<1x2x8xf32, #tpu.memory_space<vmem>>) attributes {dimension_semantics = [#tpu.dimension_semantics<parallel>, #tpu.dimension_semantics<arbitrary>], iteration_bounds = array<i64: 2, 1>, scalar_prefetch = 0 : i64, scratch_operands = 0 : i64, tpu.core_type = #tpu.core_type<tc>, window_params = [{transform_indices = @transform_0, window_bounds = array<i64: 1, 80, 72>}, {pipeline_mode = #tpu.pipeline_mode<synchronous>, transform_indices = @transform_1, window_bounds = array<i64: 72, 8>}, {transform_indices = @transform_2, window_bounds = array<i64: 80, 1>}, {transform_indices = @transform_3, window_bounds = array<i64: 1, 2, 8>}]} {
    %c0 = arith.constant 0 : index
    %c0_0 = arith.constant 0 : index
    %c0_1 = arith.constant 0 : index
    %0 = vector.load %arg2[%c0, %c0_0, %c0_1] : memref<1x80x72xf32, #tpu.memory_space<vmem>>, vector<1x80x72xf32>
    %1 = vector.shape_cast %0 : vector<1x80x72xf32> to vector<80x72xf32>
    %c0_2 = arith.constant 0 : index
    %c0_3 = arith.constant 0 : index
    %2 = vector.load %arg3[%c0_2, %c0_3] : memref<72x8xf32, #tpu.memory_space<vmem>>, vector<72x8xf32>
    %cst = arith.constant dense<0.000000e+00> : vector<80x8xf32>
    %3 = tpu.matmul %1, %2, %cst {dimension_numbers = #tpu.dot_dimension_numbers<[1], [0], [0], [1], [0, 0, 1, 1], [], []>} : vector<80x72xf32>, vector<72x8xf32>, vector<80x8xf32> -> vector<80x8xf32>
    %c0_4 = arith.constant 0 : index
    %c0_5 = arith.constant 0 : index
    %4 = vector.load %arg4[%c0_4, %c0_5] : memref<80x1xf32, #tpu.memory_space<vmem>>, vector<80x1xf32>
    %5 = vector.broadcast %4 : vector<80x1xf32> to vector<80x8xf32>
    %6 = arith.mulf %3, %5 : vector<80x8xf32>
    %cst_6 = arith.constant 1.000000e+00 : f32
    %7 = vector.broadcast %cst_6 : f32 to vector<1x80xf32>
    %cst_7 = arith.constant dense<0.000000e+00> : vector<1x8xf32>
    %8 = tpu.matmul %7, %6, %cst_7 {dimension_numbers = #tpu.dot_dimension_numbers<[1], [0], [0], [1], [0, 0, 1, 1], [], []>} : vector<1x80xf32>, vector<80x8xf32>, vector<1x8xf32> -> vector<1x8xf32>
    %9 = arith.mulf %6, %6 : vector<80x8xf32>
    %cst_8 = arith.constant dense<0.000000e+00> : vector<1x8xf32>
    %10 = tpu.matmul %7, %9, %cst_8 {dimension_numbers = #tpu.dot_dimension_numbers<[1], [0], [0], [1], [0, 0, 1, 1], [], []>} : vector<1x80xf32>, vector<80x8xf32>, vector<1x8xf32> -> vector<1x8xf32>
    %11 = tpu.concatenate %8, %10 in 0 : vector<1x8xf32>, vector<1x8xf32> -> vector<2x8xf32>
    %c0_i32 = arith.constant 0 : i32
    %12 = arith.cmpi eq, %arg1, %c0_i32 : i32
    %13 = arith.extui %12 : i1 to i32
    %c0_i32_9 = arith.constant 0 : i32
    %14 = arith.cmpi ne, %13, %c0_i32_9 : i32
    scf.if %14 {
      %c0_12 = arith.constant 0 : index
      %c0_13 = arith.constant 0 : index
      %c0_14 = arith.constant 0 : index
      %18 = vector.load %arg5[%c0_12, %c0_13, %c0_14] : memref<1x2x8xf32, #tpu.memory_space<vmem>>, vector<1x2x8xf32>
      %19 = vector.shape_cast %18 : vector<1x2x8xf32> to vector<2x8xf32>
      %20 = vector.shape_cast %11 : vector<2x8xf32> to vector<1x2x8xf32>
      tpu.vector_store %arg5[%c0_12, %c0_13, %c0_14], %20 {strides = array<i32>} : memref<1x2x8xf32, #tpu.memory_space<vmem>>, vector<1x2x8xf32>,
    } else {
    }
    %c0_i32_10 = arith.constant 0 : i32
    %15 = arith.cmpi sgt, %arg1, %c0_i32_10 : i32
    %16 = arith.extui %15 : i1 to i32
    %c0_i32_11 = arith.constant 0 : i32
    %17 = arith.cmpi ne, %16, %c0_i32_11 : i32
    scf.if %17 {
      %c0_12 = arith.constant 0 : index
      %c0_13 = arith.constant 0 : index
      %c0_14 = arith.constant 0 : index
      %18 = vector.load %arg5[%c0_12, %c0_13, %c0_14] : memref<1x2x8xf32, #tpu.memory_space<vmem>>, vector<1x2x8xf32>
      %19 = vector.shape_cast %18 : vector<1x2x8xf32> to vector<2x8xf32>
      %20 = arith.addf %19, %11 : vector<2x8xf32>
      %c0_15 = arith.constant 0 : index
      %c0_16 = arith.constant 0 : index
      %c0_17 = arith.constant 0 : index
      %21 = vector.load %arg5[%c0_15, %c0_16, %c0_17] : memref<1x2x8xf32, #tpu.memory_space<vmem>>, vector<1x2x8xf32>
      %22 = vector.shape_cast %21 : vector<1x2x8xf32> to vector<2x8xf32>
      %23 = vector.shape_cast %20 : vector<2x8xf32> to vector<1x2x8xf32>
      tpu.vector_store %arg5[%c0_15, %c0_16, %c0_17], %23 {strides = array<i32>} : memref<1x2x8xf32, #tpu.memory_space<vmem>>, vector<1x2x8xf32>,
    } else {
    }
    return
  }
  func.func @transform_0(%arg0: i32, %arg1: i32) -> (i32, i32, i32) {
    %c0_i32 = arith.constant 0 : i32
    %c0_i32_0 = arith.constant 0 : i32
    return %arg0, %arg1, %c0_i32 : i32, i32, i32
  }
  func.func @transform_1(%arg0: i32, %arg1: i32) -> (i32, i32) {
    %c0_i32 = arith.constant 0 : i32
    %c0_i32_0 = arith.constant 0 : i32
    %c0_i32_1 = arith.constant 0 : i32
    return %c0_i32, %c0_i32_0 : i32, i32
  }
  func.func @transform_2(%arg0: i32, %arg1: i32) -> (i32, i32) {
    %c0_i32 = arith.constant 0 : i32
    %c0_i32_0 = arith.constant 0 : i32
    return %arg1, %c0_i32 : i32, i32
  }
  func.func @transform_3(%arg0: i32, %arg1: i32) -> (i32, i32, i32) {
    %c0_i32 = arith.constant 0 : i32
    %c0_i32_0 = arith.constant 0 : i32
    %c0_i32_1 = arith.constant 0 : i32
    return %arg0, %c0_i32, %c0_i32_0 : i32, i32, i32
  }
}

module attributes {stable_mosaic.version = 11 : i64} {
  func.func @_pass2_kernel(%arg0: i32, %arg1: i32, %arg2: memref<1x80x72xf32, #tpu.memory_space<vmem>>, %arg3: memref<72x8xf32, #tpu.memory_space<vmem>>, %arg4: memref<1x8xf32, #tpu.memory_space<vmem>>, %arg5: memref<1x8xf32, #tpu.memory_space<vmem>>, %arg6: memref<1x80x8xf32, #tpu.memory_space<vmem>>) attributes {dimension_semantics = [#tpu.dimension_semantics<parallel>, #tpu.dimension_semantics<parallel>], iteration_bounds = array<i64: 2, 1>, scalar_prefetch = 0 : i64, scratch_operands = 0 : i64, tpu.core_type = #tpu.core_type<tc>, window_params = [{transform_indices = @transform_0, window_bounds = array<i64: 1, 80, 72>}, {pipeline_mode = #tpu.pipeline_mode<synchronous>, transform_indices = @transform_1, window_bounds = array<i64: 72, 8>}, {pipeline_mode = #tpu.pipeline_mode<synchronous>, transform_indices = @transform_2, window_bounds = array<i64: 1, 8>}, {pipeline_mode = #tpu.pipeline_mode<synchronous>, transform_indices = @transform_3, window_bounds = array<i64: 1, 8>}, {transform_indices = @transform_4, window_bounds = array<i64: 1, 80, 8>}]} {
    %c0 = arith.constant 0 : index
    %c0_0 = arith.constant 0 : index
    %c0_1 = arith.constant 0 : index
    %0 = vector.load %arg2[%c0, %c0_0, %c0_1] : memref<1x80x72xf32, #tpu.memory_space<vmem>>, vector<1x80x72xf32>
    %1 = vector.shape_cast %0 : vector<1x80x72xf32> to vector<80x72xf32>
    %c0_2 = arith.constant 0 : index
    %c0_3 = arith.constant 0 : index
    %2 = vector.load %arg3[%c0_2, %c0_3] : memref<72x8xf32, #tpu.memory_space<vmem>>, vector<72x8xf32>
    %cst = arith.constant dense<0.000000e+00> : vector<80x8xf32>
    %3 = tpu.matmul %1, %2, %cst {dimension_numbers = #tpu.dot_dimension_numbers<[1], [0], [0], [1], [0, 0, 1, 1], [], []>} : vector<80x72xf32>, vector<72x8xf32>, vector<80x8xf32> -> vector<80x8xf32>
    %c0_4 = arith.constant 0 : index
    %c0_5 = arith.constant 0 : index
    %4 = vector.load %arg4[%c0_4, %c0_5] : memref<1x8xf32, #tpu.memory_space<vmem>>, vector<1x8xf32>
    %5 = vector.broadcast %4 : vector<1x8xf32> to vector<80x8xf32>
    %6 = arith.mulf %3, %5 : vector<80x8xf32>
    %c0_6 = arith.constant 0 : index
    %c0_7 = arith.constant 0 : index
    %7 = vector.load %arg5[%c0_6, %c0_7] : memref<1x8xf32, #tpu.memory_space<vmem>>, vector<1x8xf32>
    %8 = vector.broadcast %7 : vector<1x8xf32> to vector<80x8xf32>
    %9 = arith.addf %6, %8 : vector<80x8xf32>
    %cst_8 = arith.constant 0.000000e+00 : f32
    %10 = vector.broadcast %cst_8 : f32 to vector<80x8xf32>
    %11 = arith.maximumf %9, %10 : vector<80x8xf32>
    %c0_9 = arith.constant 0 : index
    %c0_10 = arith.constant 0 : index
    %c0_11 = arith.constant 0 : index
    %12 = vector.load %arg6[%c0_9, %c0_10, %c0_11] : memref<1x80x8xf32, #tpu.memory_space<vmem>>, vector<1x80x8xf32>
    %13 = vector.shape_cast %12 : vector<1x80x8xf32> to vector<80x8xf32>
    %14 = vector.shape_cast %11 : vector<80x8xf32> to vector<1x80x8xf32>
    tpu.vector_store %arg6[%c0_9, %c0_10, %c0_11], %14 {strides = array<i32>} : memref<1x80x8xf32, #tpu.memory_space<vmem>>, vector<1x80x8xf32>,
    return
  }
  func.func @transform_0(%arg0: i32, %arg1: i32) -> (i32, i32, i32) {
    %c0_i32 = arith.constant 0 : i32
    %c0_i32_0 = arith.constant 0 : i32
    return %arg0, %arg1, %c0_i32 : i32, i32, i32
  }
  func.func @transform_1(%arg0: i32, %arg1: i32) -> (i32, i32) {
    %c0_i32 = arith.constant 0 : i32
    %c0_i32_0 = arith.constant 0 : i32
    %c0_i32_1 = arith.constant 0 : i32
    return %c0_i32, %c0_i32_0 : i32, i32
  }
  func.func @transform_2(%arg0: i32, %arg1: i32) -> (i32, i32) {
    %c0_i32 = arith.constant 0 : i32
    %c0_i32_0 = arith.constant 0 : i32
    %c0_i32_1 = arith.constant 0 : i32
    return %c0_i32, %c0_i32_0 : i32, i32
  }
  func.func @transform_3(%arg0: i32, %arg1: i32) -> (i32, i32) {
    %c0_i32 = arith.constant 0 : i32
    %c0_i32_0 = arith.constant 0 : i32
    %c0_i32_1 = arith.constant 0 : i32
    return %c0_i32, %c0_i32_0 : i32, i32
  }
  func.func @transform_4(%arg0: i32, %arg1: i32) -> (i32, i32, i32) {
    %c0_i32 = arith.constant 0 : i32
    %c0_i32_0 = arith.constant 0 : i32
    return %arg0, %arg1, %c0_i32 : i32, i32, i32
  }
}

</mosaic_0001>

<bundles_post_ra>
// kernel: down_forward.5
= control target key start
LH: loop header
LB: loop body
LE: loop exit
PB: predicated region body
PF: predicated region fallthrough
CT: control target
= control target key end

     0   :  { %s694_s15 = smov 0   ;;  %s696_s16 = smov 0   ;;  %s791_s0 = inlined_call_operand.vmem [shape: f32[2,80,36], index: 0, kind: input, shape index: {}]   ;;  %s792_s1 = inlined_call_operand.vmem [shape: f32[36,8], index: 1, kind: input, shape index: {}]   ;;  %s793_s2 = inlined_call_operand.vmem [shape: f32[1,8], index: 2, kind: input, shape index: {}]   ;;  %s794_s3 = inlined_call_operand.vmem [shape: f32[1,8], index: 3, kind: input, shape index: {}]   ;;  %s795_s4 = inlined_call_operand.vmem [shape: f32[2,80,8], index: 4, kind: output, shape index: {}]  }
   0x1   :  { %s698_s17 = smov 0  }
   0x2 LB: > { %s26_s18 = sadd.s32 1, %s663_s16  ;;  %p548_p0 = scmp.ge.s32.totalorder %s667_s17, 1  ;;  %s667_s17 = sphi %s698_s17, %s14_s17   ;;  %s663_s16 = sphi %s696_s16, %s797_s16   ;;  %s659_s15 = sphi %s694_s15, %s796_s15  }
   0x3   : > { %p28_p1 = scmp.ge.s32.totalorder %s26_s18, 2  ;;  %p183_p2 = scmp.lt.s32.totalorder %s667_s17, 3 }
   0x5   : > { %s799_s18 = smov (%p28_p1, %s26_s18), 0  ;;  %p184_p3 = pnand %p548_p0, %p183_p2 }
   0x6   : > { %v247_v0 = vld [vmem:[%s792_s1] sm:$0xff] (!%p184_p3)  ;;  %v248_v1 = vld [vmem:[%s792_s1 + $0x8] sm:$0xff] (!%p184_p3)  ;;  %v249_v2 = vld [vmem:[%s792_s1 + $0x10] sm:$0xff] (!%p184_p3)  ;;  %p218_p4 = scmp.lt.s32.totalorder (!%p184_p3), %s659_s15, 1  ;;  %vm283_vm0 = vcmask (!%p184_p3), 1043456   ;;  %vm252_vm1 = vcmask (!%p184_p3), 293888  }
   0x7   : > { %187 = sbr.rel (%p184_p3) target bundleno = 248 (0xf8), region = 36  ;;  %v606_v3 = vpack.c.bf16 (!%p184_p3), %v248_v1, %v247_v0  ;;  %v250_v4 = vld [vmem:[%s792_s1 + $0x18] sm:$0xff] (!%p184_p3)  ;;  %v251_v6 = vld [vmem:[%s792_s1 + $0x20] sm:$0xf] (!%p184_p3)  ;;  %vm446_vm2 = vcmask (!%p184_p3), 64512  }
   0x8   : > { %v610_v5 = vpack.c.bf16 (!%p184_p3), %v250_v4, %v249_v2  ;;  %v562_v17 = vld [vmem:[%s793_s2] ss:$0 sm:$0xff] (!%p184_p3) }
   0x9   : > { %607 = vmatprep.subr.bf16.mxu0 (!%p184_p3), %v606_v3  ;;  %614 = vmatprep.subr.bf16.mxu1 (!%p184_p3), %v606_v3  ;;  %v563_v19 = vld [vmem:[%s794_s3] ss:$0 sm:$0xff] (!%p184_p3) }
   0xa   : > { %609 = vmatpush3.bf16.msra.mxu0 (!%p184_p3), %v606_v3  ;;  %617 = vmatpush3.bf16.msra.mxu1 (!%p184_p3), %v606_v3 }
   0xb   : > { %611 = vmatprep.subr.bf16.mxu0 (!%p184_p3), %v610_v5  ;;  %615 = vmatprep.subr.bf16.mxu1 (!%p184_p3), %v610_v5 }
   0xe   : > { %s801_s15 = smov (!%p218_p4, %s659_s15), 1  ;;  %613 = vmatpush3.bf16.msra.mxu0 %v610_v5  ;;  %618 = vmatpush3.bf16.msra.mxu1 %v610_v5 }
   0xf   : > { %s620_s27 = smul.u32 80, %s801_s15  ;;  %589 = vmatprep.subr.msk.mxu0 %vm283_vm0, %v251_v6  ;;  %616 = vmatprep.subr.msk.mxu1 %vm283_vm0, %v251_v6 }
  0x11   : > { %s225_s6 = scalar_lea.vmem %s791_s0, %s620_s27  ;;  %s760_s13 = scalar_lea.vmem %s795_s4, %s620_s27 }
  0x12   : > { %v237_v7 = vld [vmem:[%s225_s6] sm:$0xff]  ;;  %v243_v8 = vld [vmem:[%s225_s6 + $0x30] sm:$0xff]  ;;  %v238_v9 = vld [vmem:[%s225_s6 + $0x8] sm:$0xff]  ;;  %590 = vmatpush3.msk.msra.mxu0 %vm283_vm0, %v251_v6  ;;  %619 = vmatpush3.msk.msra.mxu1 %vm283_vm0, %v251_v6 }
  0x13   : > { %591 = vmatprep.mubr.msk.f32.mxu0 %vm252_vm1, %v237_v7  ;;  %600 = vmatprep.mubr.msk.f32.mxu1 %vm252_vm1, %v243_v8  ;;  %v244_v10 = vld [vmem:[%s225_s6 + $0x38] sm:$0xff]  ;;  %v239_v11 = vld [vmem:[%s225_s6 + $0x10] sm:$0xff]  ;;  %v245_v12 = vld [vmem:[%s225_s6 + $0x40] sm:$0xff] }
  0x14   : > { %592 = vmatmul.mubr.msk.f32.vlgmr.msra.gmra.mrb[0].mxu0 %vm252_vm1, %v238_v9  ;;  %601 = vmatmul.mubr.msk.f32.vlgmr.msra.gmra.mrb[0].mxu1 %vm252_vm1, %v244_v10  ;;  %v240_v13 = vld [vmem:[%s225_s6 + $0x18] sm:$0xff]  ;;  %v246_v14 = vld [vmem:[%s225_s6 + $0x48] sm:$0xff]  ;;  %v241_v15 = vld [vmem:[%s225_s6 + $0x20] sm:$0xff] }
  0x15   : > { %594 = vmatprep.mubr.msk.f32.mxu0 %vm252_vm1, %v239_v11  ;;  %603 = vmatprep.mubr.msk.f32.mxu1 %vm252_vm1, %v245_v12  ;;  %v242_v16 = vld [vmem:[%s225_s6 + $0x28] sm:$0xff] }
  0x18   : > { %595 = vmatmul.mubr.msk.f32.gmra.mrb[2].mxu0 %vm252_vm1, %v240_v13  ;;  %604 = vmatmul.mubr.msk.f32.gmra.mrb[2].mxu1 %vm252_vm1, %v246_v14 }
  0x19   : > { %597 = vmatprep.mubr.msk.f32.mxu0 %vm252_vm1, %v241_v15 }
  0x1c   : > { %598 = vmatmul.mubr.msk.f32.gmra.mrb[4].mxu0 %vm252_vm1, %v242_v16 }
  0xe7   : > { %v593_v18 = vpop.f32.mrb[0].mxu0  ;;  %v602_v20 = vpop.f32.mrb[0].mxu1 }
  0xe8   : > { %v410_v21 = vmul.f32 %v593_v18, %v562_v17  ;;  %v353_v22 = vpop.f32.mrb[1].mxu0  ;;  %v416_v23 = vmul.f32 %v602_v20, %v562_v17  ;;  %v383_v24 = vpop.f32.mrb[1].mxu1 }
  0xe9   : > { %v409_v25 = vmul.f32 %v562_v17, %v353_v22  ;;  %v415_v26 = vmul.f32 %v562_v17, %v383_v24 }
  0xea   : > { %v427_v27 = vadd.f32 %v563_v19, %v410_v21  ;;  %v433_v28 = vadd.f32 %v563_v19, %v416_v23 }
  0xeb   : > { %v426_v29 = vadd.f32 %v563_v19, %v409_v25  ;;  %v596_v30 = vpop.f32.mrb[2].mxu0  ;;  %v432_v31 = vadd.f32 %v563_v19, %v415_v26  ;;  %v605_v32 = vpop.f32.mrb[2].mxu1 }
  0xec   : > { %v437_v33 = vmax.f32 %v427_v27, 0.0  ;;  %v443_v34 = vmax.f32 %v433_v28, 0.0  ;;  %v412_v35 = vmul.f32 %v596_v30, %v562_v17  ;;  %v363_v36 = vpop.f32.mrb[3].mxu0  ;;  %v418_v37 = vmul.f32 %v605_v32, %v562_v17  ;;  %v393_v38 = vpop.f32.mrb[3].mxu1 }
  0xed   : > { %v436_v39 = vmax.f32 %v426_v29, 0.0  ;;  %v442_v40 = vmax.f32 %v432_v31, 0.0  ;;  %v411_v41 = vmul.f32 %v562_v17, %v363_v36  ;;  %v417_v42 = vmul.f32 %v562_v17, %v393_v38 }
  0xee   : > { %448 = vst.msk [vmem:[%s760_s13 + $0x8] sm:$0xff] %vm446_vm2, %v437_v33  ;;  %454 = vst.msk [vmem:[%s760_s13 + $0x38] sm:$0xff] %vm446_vm2, %v443_v34  ;;  %v429_v43 = vadd.f32 %v563_v19, %v412_v35  ;;  %v435_v44 = vadd.f32 %v563_v19, %v418_v37 }
  0xef   : > { %447 = vst.msk [vmem:[%s760_s13] sm:$0xff] %vm446_vm2, %v436_v39  ;;  %453 = vst.msk [vmem:[%s760_s13 + $0x30] sm:$0xff] %vm446_vm2, %v442_v40  ;;  %v428_v45 = vadd.f32 %v563_v19, %v411_v41  ;;  %v599_v46 = vpop.f32.mrb[4].mxu0  ;;  %v434_v47 = vadd.f32 %v563_v19, %v417_v42 }
  0xf0   : > { %v439_v48 = vmax.f32 %v429_v43, 0.0  ;;  %v445_v49 = vmax.f32 %v435_v44, 0.0  ;;  %v414_v50 = vmul.f32 %v599_v46, %v562_v17  ;;  %v373_v51 = vpop.f32.mrb[5].mxu0 }
  0xf1   : > { %v438_v52 = vmax.f32 %v428_v45, 0.0  ;;  %v444_v53 = vmax.f32 %v434_v47, 0.0  ;;  %v413_v54 = vmul.f32 %v562_v17, %v373_v51 }
  0xf2   : > { %450 = vst.msk [vmem:[%s760_s13 + $0x18] sm:$0xff] %vm446_vm2, %v439_v48  ;;  %456 = vst.msk [vmem:[%s760_s13 + $0x48] sm:$0xff] %vm446_vm2, %v445_v49  ;;  %v431_v55 = vadd.f32 %v563_v19, %v414_v50 }
  0xf3   : > { %449 = vst.msk [vmem:[%s760_s13 + $0x10] sm:$0xff] %vm446_vm2, %v438_v52  ;;  %455 = vst.msk [vmem:[%s760_s13 + $0x40] sm:$0xff] %vm446_vm2, %v444_v53  ;;  %v430_v56 = vadd.f32 %v563_v19, %v413_v54 }
  0xf4   : > { %v441_v57 = vmax.f32 %v431_v55, 0.0 }
  0xf5   : > { %v440_v58 = vmax.f32 %v430_v56, 0.0 }
  0xf6   : > { %452 = vst.msk [vmem:[%s760_s13 + $0x28] sm:$0xff] %vm446_vm2, %v441_v57 }
  0xf7   : > { %451 = vst.msk [vmem:[%s760_s13 + $0x20] sm:$0xff] %vm446_vm2, %v440_v58 }
  0xf8 PF: > { %s14_s17 = sadd.s32 1, %s667_s17   ;;  %s796_s15 = smov %s663_s16 }
  0xf9   : > { %p11_p5 = scmp.ge.s32.totalorder %s14_s17, 4   ;;  %s797_s16 = smov %s799_s18 }
  0xfb   :  { %13 = sbr.rel (!%p11_p5) target bundleno = 2 (0x2), region = 66 }

// kernel: down_forward.4
= control target key start
LH: loop header
LB: loop body
LE: loop exit
PB: predicated region body
PF: predicated region fallthrough
CT: control target
= control target key end

     0   :  { %s960_s12 = smov 0   ;;  %s962_s13 = smov 0   ;;  %s1074_s0 = inlined_call_operand.vmem [shape: f32[2,80,36], index: 0, kind: input, shape index: {}]   ;;  %s1075_s1 = inlined_call_operand.vmem [shape: f32[36,8], index: 1, kind: input, shape index: {}]   ;;  %s1076_s2 = inlined_call_operand.vmem [shape: f32[80,1], index: 2, kind: input, shape index: {}]   ;;  %s1077_s3 = inlined_call_operand.vmem [shape: f32[2,2,8], index: 3, kind: output, shape index: {}]  }
   0x1   :  { %s964_s14 = smov 0  }
   0x2 LB: > { %s25_s15 = sadd.s32 1, %s929_s13  ;;  %p715_p0 = scmp.ge.s32.totalorder %s933_s14, 1  ;;  %s933_s14 = sphi %s964_s14, %s13_s14   ;;  %s929_s13 = sphi %s962_s13, %s1079_s13   ;;  %s925_s12 = sphi %s960_s12, %s1078_s12  }
   0x3   : > { %p27_p1 = scmp.ge.s32.totalorder %s25_s15, 2  ;;  %p167_p2 = scmp.lt.s32.totalorder %s933_s14, 3 }
   0x5   : > { %s1081_s15 = smov (%p27_p1, %s25_s15), 0  ;;  %p168_p3 = pnand %p715_p0, %p167_p2 }
   0x6   : > { %v229_v0 = vld [vmem:[%s1075_s1] sm:$0xff] (!%p168_p3)  ;;  %v230_v1 = vld [vmem:[%s1075_s1 + $0x8] sm:$0xff] (!%p168_p3)  ;;  %v231_v2 = vld [vmem:[%s1075_s1 + $0x10] sm:$0xff] (!%p168_p3)  ;;  %p200_p4 = scmp.lt.s32.totalorder (!%p168_p3), %s925_s12, 1  ;;  %v935_v7 = vmov (!%p168_p3), 0   ;;  %vm234_vm0 = vcmask (!%p168_p3), 293888  }
   0x7   : > { %171 = sbr.rel (%p168_p3) target bundleno = 474 (0x1da), region = 32  ;;  %v841_v3 = vpack.c.bf16 (!%p168_p3), %v230_v1, %v229_v0  ;;  %v232_v4 = vld [vmem:[%s1075_s1 + $0x18] sm:$0xff] (!%p168_p3)  ;;  %v384_v5 = vld [vmem:[%s1076_s2] sm:$0xff] (!%p168_p3)  ;;  %909 = vset.pattern.permute.xlu0 (!%p168_p3), %v935_v7  ;;  %910 = vset.pattern.permute.xlu1 (!%p168_p3), %v935_v7  ;;  %v386_v8 = vld [vmem:[%s1076_s2 + $0x10] sm:$0xff] (!%p168_p3)  ;;  %vm265_vm1 = vcmask (!%p168_p3), 1043456   ;;  %v936_v28 = vmov (!%p168_p3), 0.0|0.0  }
   0x8   : > { %v845_v6 = vpack.c.bf16 (!%p168_p3), %v232_v4, %v231_v2  ;;  %396 = vperm.xlu0 (!%p168_p3), %909, %v384_v5   ;;  %406 = vperm.xlu1 (!%p168_p3), %910, %v386_v8   ;;  %v385_v9 = vld [vmem:[%s1076_s2 + $0x8] sm:$0xff] (!%p168_p3)  ;;  %v233_v10 = vld [vmem:[%s1075_s1 + $0x20] sm:$0xf] (!%p168_p3)  ;;  %v387_v11 = vld [vmem:[%s1076_s2 + $0x18] sm:$0xff] (!%p168_p3)  ;;  %vm937_vm2 = vmmov (!%p168_p3), 0   ;;  %v938_v29 = vmov (!%p168_p3), 0.0  }
   0x9   : > { %842 = vmatprep.subr.bf16.mxu0 (!%p168_p3), %v841_v3  ;;  %v388_v13 = vld [vmem:[%s1076_s2 + $0x20] sm:$0xff] (!%p168_p3)  ;;  %v389_v15 = vld [vmem:[%s1076_s2 + $0x28] sm:$0xff] (!%p168_p3)  ;;  %v390_v17 = vld [vmem:[%s1076_s2 + $0x30] sm:$0xff] (!%p168_p3)  ;;  %849 = vmatprep.subr.bf16.mxu1 (!%p168_p3), %v936_v28  ;;  %vm454_vm3 = vcmask (!%p168_p3), 654336   ;;  %vm611_vm4 = vcmask (!%p168_p3), 1040384   ;;  %vm617_vm5 = vcmask (!%p168_p3), 58368  }
   0xa   : > { %844 = vmatpush3.bf16.msra.mxu0 (!%p168_p3), %v841_v3  ;;  %v391_v19 = vld [vmem:[%s1076_s2 + $0x38] sm:$0xff] (!%p168_p3)  ;;  %v392_v21 = vld [vmem:[%s1076_s2 + $0x40] sm:$0xff] (!%p168_p3)  ;;  %v393_v23 = vld [vmem:[%s1076_s2 + $0x48] sm:$0xff] (!%p168_p3)  ;;  %815 = vmatprep.mubr.msk.f32.mxu1 (!%p168_p3), %vm937_vm2, %v938_v29 }
   0xb   : > { %846 = vmatprep.subr.bf16.mxu0 (!%p168_p3), %v845_v6 }
   0xc   : > { %401 = vperm.xlu0 (!%p168_p3), %909, %v385_v9   ;;  %411 = vperm.xlu1 (!%p168_p3), %910, %v387_v11  }
   0xe   : > { %s1083_s12 = smov (!%p200_p4, %s925_s12), 1  ;;  %848 = vmatpush3.bf16.msra.mxu0 %v845_v6 }
   0xf   : > { %s879_s28 = smul.u32 80, %s1083_s12  ;;  %778 = vmatprep.subr.msk.mxu0 %vm265_vm1, %v233_v10  ;;  %s717_s27 = sshll.u32 %s1083_s12, 1 }
  0x10   : > { %416 = vperm.xlu0 %909, %v388_v13   ;;  %421 = vperm.xlu1 %910, %v389_v15   ;;  %s218_s30 = scalar_lea.vmem %s1077_s3, %s717_s27 }
  0x11   : > { %s1008_s8 = scalar_lea.vmem %s1074_s0, %s879_s28 }
  0x12   : > { %v219_v12 = vld [vmem:[%s1008_s8] sm:$0xff]  ;;  %v220_v14 = vld [vmem:[%s1008_s8 + $0x8] sm:$0xff]  ;;  %v221_v16 = vld [vmem:[%s1008_s8 + $0x10] sm:$0xff]  ;;  %779 = vmatpush3.msk.msra.mxu0 %vm265_vm1, %v233_v10 }
  0x13   : > { %780 = vmatprep.mubr.msk.f32.mxu0 %vm234_vm0, %v219_v12  ;;  %v222_v18 = vld [vmem:[%s1008_s8 + $0x18] sm:$0xff]  ;;  %v223_v20 = vld [vmem:[%s1008_s8 + $0x20] sm:$0xff]  ;;  %v224_v22 = vld [vmem:[%s1008_s8 + $0x28] sm:$0xff]  ;;  %864 = vmatprep.subr.bf16.mxu0 %v936_v28 }
  0x14   : > { %781 = vmatmul.mubr.msk.f32.vlgmr.msra.gmra.mrb[0].mxu0 %vm234_vm0, %v220_v14  ;;  %426 = vperm.xlu0 %909, %v390_v17   ;;  %v225_v24 = vld [vmem:[%s1008_s8 + $0x30] sm:$0xff]  ;;  %v226_v25 = vld [vmem:[%s1008_s8 + $0x38] sm:$0xff]  ;;  %v227_v26 = vld [vmem:[%s1008_s8 + $0x40] sm:$0xff] }
  0x15   : > { %783 = vmatprep.mubr.msk.f32.mxu0 %vm234_vm0, %v221_v16  ;;  %431 = vperm.xlu1 %910, %v391_v19   ;;  %v228_v27 = vld [vmem:[%s1008_s8 + $0x48] sm:$0xff]  ;;  %v939_v16 = vmov 1.0  }
  0x18   : > { %784 = vmatmul.mubr.msk.f32.gmra.mrb[2].mxu0 %vm234_vm0, %v222_v18  ;;  %436 = vperm.xlu0 %909, %v392_v21  }
  0x19   : > { %786 = vmatprep.mubr.msk.f32.mxu0 %vm234_vm0, %v223_v20  ;;  %441 = vperm.xlu1 %910, %v393_v23  }
  0x1c   : > { %787 = vmatmul.mubr.msk.f32.gmra.mrb[4].mxu0 %vm234_vm0, %v224_v22 }
  0x1d   : > { %789 = vmatprep.mubr.msk.f32.mxu0 %vm234_vm0, %v225_v24 }
  0x20   : > { %790 = vmatmul.mubr.msk.f32.gmra.mrb[6].mxu0 %vm234_vm0, %v226_v25 }
  0x21   : > { %792 = vmatprep.mubr.msk.f32.mxu0 %vm234_vm0, %v227_v26 }
  0x24   : > { %793 = vmatmul.mubr.msk.f32.gmra.mrb[8].mxu0 %vm234_vm0, %v228_v27 }
  0x25   : > { %838 = vmatprep.mubr.msk.f32.mxu0 %vm937_vm2, %v938_v29 }
  0x87   : > { %v407_v30 = vpop.permute.xlu1 %406  ;;  %v397_v31 = vpop.permute.xlu0 %396 }
  0x8b   : > { %v412_v32 = vpop.permute.xlu1 %411  ;;  %v402_v33 = vpop.permute.xlu0 %401 }
  0x8f   : > { %v422_v39 = vpop.permute.xlu1 %421  ;;  %v417_v43 = vpop.permute.xlu0 %416 }
  0x93   : > { %v427_v57 = vpop.permute.xlu0 %426 }
  0x94   : > { %v432_v54 = vpop.permute.xlu1 %431 }
  0x97   : > { %v437_v7 = vpop.permute.xlu0 %436 }
  0x98   : > { %v442_v3 = vpop.permute.xlu1 %441 }
  0xe7   : > { %v782_v34 = vpop.f32.mrb[0].mxu0 }
  0xe8   : > { %v445_v35 = vmul.f32 %v782_v34, %v402_v33  ;;  %v335_v36 = vpop.f32.mrb[1].mxu0 }
  0xe9   : > { %v444_v37 = vmul.f32 %v397_v31, %v335_v36 }
  0xea   : > { %v529_v38 = vmul.f32 %v445_v35, %v445_v35 }
  0xeb   : > { %v528_v40 = vmul.f32 %v444_v37, %v444_v37  ;;  %v785_v41 = vpop.f32.mrb[2].mxu0  ;;  %v850_v42 = vpack.c.bf16 %v445_v35, %v444_v37 }
  0xec   : > { %v447_v44 = vmul.f32 %v785_v41, %v412_v32  ;;  %v345_v45 = vpop.f32.mrb[3].mxu0 }
  0xed   : > { %v865_v46 = vpack.c.bf16 %v529_v38, %v528_v40  ;;  %v446_v47 = vmul.f32 %v407_v30, %v345_v45  ;;  %851 = vmatpush3.bf16.msra.mxu1 %v850_v42 }
  0xee   : > { %v531_v48 = vmul.f32 %v447_v44, %v447_v44  ;;  %852 = vmatprep.subr.bf16.mxu1 %v936_v28 }
  0xef   : > { %v853_v49 = vpack.c.bf16 %v447_v44, %v446_v47  ;;  %v530_v50 = vmul.f32 %v446_v47, %v446_v47  ;;  %v788_v51 = vpop.f32.mrb[4].mxu0  ;;  %866 = vmatpush3.bf16.msra.mxu0 %v865_v46 }
  0xf0   : > { %v449_v52 = vmul.f32 %v788_v51, %v422_v39  ;;  %v355_v53 = vpop.f32.mrb[5].mxu0  ;;  %867 = vmatprep.subr.bf16.mxu0 %v936_v28 }
  0xf1   : > { %v868_v55 = vpack.c.bf16 %v531_v48, %v530_v50  ;;  %v448_v56 = vmul.f32 %v417_v43, %v355_v53  ;;  %854 = vmatpush3.bf16.msra.mxu1 %v853_v49 }
  0xf2   : > { %v533_v58 = vmul.f32 %v449_v52, %v449_v52  ;;  %855 = vmatprep.subr.bf16.mxu1 %v936_v28 }
  0xf3   : > { %v856_v59 = vpack.c.bf16 %v449_v52, %v448_v56  ;;  %v532_v60 = vmul.f32 %v448_v56, %v448_v56  ;;  %v791_v61 = vpop.f32.mrb[6].mxu0  ;;  %869 = vmatpush3.bf16.msra.mxu0 %v868_v55 }
  0xf4   : > { %v451_v62 = vmul.f32 %v791_v61, %v432_v54  ;;  %v365_v63 = vpop.f32.mrb[7].mxu0  ;;  %870 = vmatprep.subr.bf16.mxu0 %v936_v28 }
  0xf5   : > { %v871_v0 = vpack.c.bf16 %v533_v58, %v532_v60  ;;  %v450_v1 = vmul.f32 %v427_v57, %v365_v63  ;;  %857 = vmatpush3.bf16.msra.mxu1 %v856_v59 }
  0xf6   : > { %v535_v2 = vmul.f32 %v451_v62, %v451_v62  ;;  %858 = vmatprep.subr.bf16.mxu1 %v936_v28 }
  0xf7   : > { %v859_v4 = vpack.c.bf16 %v451_v62, %v450_v1  ;;  %v534_v5 = vmul.f32 %v450_v1, %v450_v1  ;;  %v794_v6 = vpop.f32.mrb[8].mxu0  ;;  %872 = vmatpush3.bf16.msra.mxu0 %v871_v0 }
  0xf8   : > { %v453_v8 = vmul.f32 %v794_v6, %v442_v3  ;;  %v375_v9 = vpop.f32.mrb[9].mxu0  ;;  %873 = vmatprep.subr.bf16.mxu0 %v936_v28 }
  0xf9   : > { %v874_v10 = vpack.c.bf16 %v535_v2, %v534_v5  ;;  %v452_v11 = vmul.f32 %v437_v7, %v375_v9  ;;  %860 = vmatpush3.bf16.msra.mxu1 %v859_v4 }
  0xfa   : > { %v537_v12 = vmul.f32 %v453_v8, %v453_v8  ;;  %861 = vmatprep.subr.bf16.mxu1 %v936_v28 }
  0xfb   : > { %v862_v13 = vpack.c.bf16 %v453_v8, %v452_v11  ;;  %v536_v14 = vmul.f32 %v452_v11, %v452_v11  ;;  %875 = vmatpush3.bf16.msra.mxu0 %v874_v10 }
  0xfc   : > { %876 = vmatprep.subr.bf16.mxu0 %v936_v28 }
  0xfd   : > { %v877_v15 = vpack.c.bf16 %v537_v12, %v536_v14  ;;  %863 = vmatpush3.bf16.msra.mxu1 %v862_v13 }
  0xff   : > { %878 = vmatpush3.bf16.msra.mxu0 %v877_v15 }
 0x100   : > { %816 = vmatmul.mubr.msk.f32.vlgmr.msra.gmra.mrb[0].mxu1 %vm454_vm3, %v939_v16 }
 0x102   : > { %839 = vmatmul.mubr.msk.f32.vlgmr.msra.gmra.mrb[10].mxu0 %vm454_vm3, %v939_v16 }
 0x1d3   : > { %v524_v17 = vpop.f32.mrb[0].mxu1 }
 0x1d4   : > { %v817_v18 = vpop.f32.mrb[1].mxu1 }
 0x1d5   : > { %v604_v19 = vpop.f32.mrb[10].mxu0 }
 0x1d6   : > { %v609_v20 = vrot.slane %v604_v19, 7  ;;  %v840_v21 = vpop.f32.mrb[11].mxu0 }
 0x1d8   : > { %v612_v22 = vsel %vm611_vm4, %v524_v17, %v609_v20 }
 0x1d9   : > { %618 = vst.msk [vmem:[%s218_s30] sm:$0x3] %vm617_vm5, %v612_v22 }
 0x1da PF: > { %s13_s14 = sadd.s32 1, %s933_s14   ;;  %s1078_s12 = smov %s929_s13 }
 0x1db   : > { %p10_p5 = scmp.ge.s32.totalorder %s13_s14, 4   ;;  %s1079_s13 = smov %s1081_s15 }
 0x1dd   :  { %12 = sbr.rel (!%p10_p5) target bundleno = 2 (0x2), region = 73 }

// kernel: down_forward.7
= control target key start
LH: loop header
LB: loop body
LE: loop exit
PB: predicated region body
PF: predicated region fallthrough
CT: control target
= control target key end

     0   :  { %s717_s15 = smov 0   ;;  %s719_s16 = smov 0   ;;  %s834_s0 = inlined_call_operand.vmem [shape: f32[2,80,72], index: 0, kind: input, shape index: {}]   ;;  %s835_s1 = inlined_call_operand.vmem [shape: f32[72,8], index: 1, kind: input, shape index: {}]   ;;  %s836_s2 = inlined_call_operand.vmem [shape: f32[1,8], index: 2, kind: input, shape index: {}]   ;;  %s837_s3 = inlined_call_operand.vmem [shape: f32[1,8], index: 3, kind: input, shape index: {}]   ;;  %s838_s4 = inlined_call_operand.vmem [shape: f32[2,80,8], index: 4, kind: output, shape index: {}]  }
   0x1   :  { %s721_s17 = smov 0  }
   0x2 LB: > { %s26_s18 = sadd.s32 1, %s686_s16  ;;  %p548_p0 = scmp.ge.s32.totalorder %s690_s17, 1  ;;  %s690_s17 = sphi %s721_s17, %s14_s17   ;;  %s686_s16 = sphi %s719_s16, %s840_s16   ;;  %s682_s15 = sphi %s717_s15, %s839_s15  }
   0x3   : > { %p28_p1 = scmp.ge.s32.totalorder %s26_s18, 2  ;;  %p183_p2 = scmp.lt.s32.totalorder %s690_s17, 3 }
   0x5   : > { %s842_s18 = smov (%p28_p1, %s26_s18), 0  ;;  %p184_p3 = pnand %p548_p0, %p183_p2 }
   0x6   : > { %v247_v0 = vld [vmem:[%s835_s1] sm:$0xff] (!%p184_p3)  ;;  %v248_v1 = vld [vmem:[%s835_s1 + $0x8] sm:$0xff] (!%p184_p3)  ;;  %v249_v2 = vld [vmem:[%s835_s1 + $0x10] sm:$0xff] (!%p184_p3)  ;;  %p218_p4 = scmp.lt.s32.totalorder (!%p184_p3), %s682_s15, 1  ;;  %vm256_vm0 = vcmask (!%p184_p3), 588800   ;;  %vm446_vm1 = vcmask (!%p184_p3), 64512  }
   0x7   : > { %187 = sbr.rel (%p184_p3) target bundleno = 255 (0xff), region = 36  ;;  %v617_v3 = vpack.c.bf16 (!%p184_p3), %v248_v1, %v247_v0  ;;  %v250_v4 = vld [vmem:[%s835_s1 + $0x18] sm:$0xff] (!%p184_p3)  ;;  %v251_v6 = vld [vmem:[%s835_s1 + $0x20] sm:$0xff] (!%p184_p3)  ;;  %v252_v7 = vld [vmem:[%s835_s1 + $0x28] sm:$0xff] (!%p184_p3) }
   0x8   : > { %v621_v5 = vpack.c.bf16 (!%p184_p3), %v250_v4, %v249_v2  ;;  %v625_v8 = vpack.c.bf16 (!%p184_p3), %v252_v7, %v251_v6  ;;  %v253_v9 = vld [vmem:[%s835_s1 + $0x30] sm:$0xff] (!%p184_p3)  ;;  %v254_v10 = vld [vmem:[%s835_s1 + $0x38] sm:$0xff] (!%p184_p3)  ;;  %v255_v14 = vld [vmem:[%s835_s1 + $0x40] sm:$0xff] (!%p184_p3) }
   0x9   : > { %618 = vmatprep.subr.bf16.mxu0 (!%p184_p3), %v617_v3  ;;  %633 = vmatprep.subr.bf16.mxu1 (!%p184_p3), %v617_v3  ;;  %v629_v13 = vpack.c.bf16 (!%p184_p3), %v254_v10, %v253_v9  ;;  %v561_v23 = vld [vmem:[%s836_s2] ss:$0 sm:$0xff] (!%p184_p3) }
   0xa   : > { %620 = vmatpush3.bf16.msra.mxu0 (!%p184_p3), %v617_v3  ;;  %638 = vmatpush3.bf16.msra.mxu1 (!%p184_p3), %v617_v3  ;;  %v562_v25 = vld [vmem:[%s837_s3] ss:$0 sm:$0xff] (!%p184_p3) }
   0xb   : > { %622 = vmatprep.subr.bf16.mxu0 (!%p184_p3), %v621_v5  ;;  %634 = vmatprep.subr.bf16.mxu1 (!%p184_p3), %v621_v5 }
   0xe   : > { %s844_s15 = smov (!%p218_p4, %s682_s15), 1  ;;  %624 = vmatpush3.bf16.msra.mxu0 %v621_v5  ;;  %639 = vmatpush3.bf16.msra.mxu1 %v621_v5 }
   0xf   : > { %s643_s5 = smul.u32 80, %s844_s15  ;;  %626 = vmatprep.subr.bf16.mxu0 %v625_v8  ;;  %635 = vmatprep.subr.bf16.mxu1 %v625_v8 }
  0x11   : > { %s767_s12 = scalar_lea.vmem %s834_s0, %s643_s5  ;;  %s803_s25 = scalar_lea.vmem %s838_s4, %s643_s5 }
  0x12   : > { %v237_v11 = vld [vmem:[%s767_s12] sm:$0xff]  ;;  %v243_v12 = vld [vmem:[%s767_s12 + $0x30] sm:$0xff]  ;;  %628 = vmatpush3.bf16.msra.mxu0 %v625_v8  ;;  %640 = vmatpush3.bf16.msra.mxu1 %v625_v8  ;;  %v238_v15 = vld [vmem:[%s767_s12 + $0x8] sm:$0xff] }
  0x13   : > { %602 = vmatprep.mubr.msk.f32.mxu0 %vm256_vm0, %v237_v11  ;;  %611 = vmatprep.mubr.msk.f32.mxu1 %vm256_vm0, %v243_v12  ;;  %v244_v16 = vld [vmem:[%s767_s12 + $0x38] sm:$0xff]  ;;  %v239_v17 = vld [vmem:[%s767_s12 + $0x10] sm:$0xff]  ;;  %v245_v18 = vld [vmem:[%s767_s12 + $0x40] sm:$0xff] }
  0x14   : > { %630 = vmatprep.subr.bf16.mxu0 %v629_v13  ;;  %636 = vmatprep.subr.bf16.mxu1 %v629_v13  ;;  %v240_v19 = vld [vmem:[%s767_s12 + $0x18] sm:$0xff]  ;;  %v246_v20 = vld [vmem:[%s767_s12 + $0x48] sm:$0xff]  ;;  %v241_v21 = vld [vmem:[%s767_s12 + $0x20] sm:$0xff] }
  0x15   : > { %v242_v22 = vld [vmem:[%s767_s12 + $0x28] sm:$0xff] }
  0x16   : > { %632 = vmatpush3.bf16.msra.mxu0 %v629_v13  ;;  %641 = vmatpush3.bf16.msra.mxu1 %v629_v13 }
  0x17   : > { %600 = vmatprep.subr.mxu0 %v255_v14  ;;  %637 = vmatprep.subr.mxu1 %v255_v14 }
  0x1a   : > { %601 = vmatpush3.msra.mxu0 %v255_v14  ;;  %642 = vmatpush3.msra.mxu1 %v255_v14 }
  0x1b   : > { %603 = vmatmul.mubr.msk.f32.vlgmr.msra.gmra.mrb[0].mxu0 %vm256_vm0, %v238_v15  ;;  %612 = vmatmul.mubr.msk.f32.vlgmr.msra.gmra.mrb[0].mxu1 %vm256_vm0, %v244_v16 }
  0x1c   : > { %605 = vmatprep.mubr.msk.f32.mxu0 %vm256_vm0, %v239_v17  ;;  %614 = vmatprep.mubr.msk.f32.mxu1 %vm256_vm0, %v245_v18 }
  0x1f   : > { %606 = vmatmul.mubr.msk.f32.gmra.mrb[2].mxu0 %vm256_vm0, %v240_v19  ;;  %615 = vmatmul.mubr.msk.f32.gmra.mrb[2].mxu1 %vm256_vm0, %v246_v20 }
  0x20   : > { %608 = vmatprep.mubr.msk.f32.mxu0 %vm256_vm0, %v241_v21 }
  0x23   : > { %609 = vmatmul.mubr.msk.f32.gmra.mrb[4].mxu0 %vm256_vm0, %v242_v22 }
  0xee   : > { %v604_v24 = vpop.f32.mrb[0].mxu0  ;;  %v613_v26 = vpop.f32.mrb[0].mxu1 }
  0xef   : > { %v410_v27 = vmul.f32 %v604_v24, %v561_v23  ;;  %v353_v28 = vpop.f32.mrb[1].mxu0  ;;  %v416_v29 = vmul.f32 %v613_v26, %v561_v23  ;;  %v383_v30 = vpop.f32.mrb[1].mxu1 }
  0xf0   : > { %v409_v31 = vmul.f32 %v561_v23, %v353_v28  ;;  %v415_v32 = vmul.f32 %v561_v23, %v383_v30 }
  0xf1   : > { %v427_v33 = vadd.f32 %v562_v25, %v410_v27  ;;  %v433_v34 = vadd.f32 %v562_v25, %v416_v29 }
  0xf2   : > { %v426_v35 = vadd.f32 %v562_v25, %v409_v31  ;;  %v607_v36 = vpop.f32.mrb[2].mxu0  ;;  %v432_v37 = vadd.f32 %v562_v25, %v415_v32  ;;  %v616_v38 = vpop.f32.mrb[2].mxu1 }
  0xf3   : > { %v437_v39 = vmax.f32 %v427_v33, 0.0  ;;  %v443_v40 = vmax.f32 %v433_v34, 0.0  ;;  %v412_v41 = vmul.f32 %v607_v36, %v561_v23  ;;  %v363_v42 = vpop.f32.mrb[3].mxu0  ;;  %v418_v43 = vmul.f32 %v616_v38, %v561_v23  ;;  %v393_v44 = vpop.f32.mrb[3].mxu1 }
  0xf4   : > { %v436_v45 = vmax.f32 %v426_v35, 0.0  ;;  %v442_v46 = vmax.f32 %v432_v37, 0.0  ;;  %v411_v47 = vmul.f32 %v561_v23, %v363_v42  ;;  %v417_v48 = vmul.f32 %v561_v23, %v393_v44 }
  0xf5   : > { %448 = vst.msk [vmem:[%s803_s25 + $0x8] sm:$0xff] %vm446_vm1, %v437_v39  ;;  %454 = vst.msk [vmem:[%s803_s25 + $0x38] sm:$0xff] %vm446_vm1, %v443_v40  ;;  %v429_v49 = vadd.f32 %v562_v25, %v412_v41  ;;  %v435_v50 = vadd.f32 %v562_v25, %v418_v43 }
  0xf6   : > { %447 = vst.msk [vmem:[%s803_s25] sm:$0xff] %vm446_vm1, %v436_v45  ;;  %453 = vst.msk [vmem:[%s803_s25 + $0x30] sm:$0xff] %vm446_vm1, %v442_v46  ;;  %v428_v51 = vadd.f32 %v562_v25, %v411_v47  ;;  %v610_v52 = vpop.f32.mrb[4].mxu0  ;;  %v434_v53 = vadd.f32 %v562_v25, %v417_v48 }
  0xf7   : > { %v439_v54 = vmax.f32 %v429_v49, 0.0  ;;  %v445_v55 = vmax.f32 %v435_v50, 0.0  ;;  %v414_v56 = vmul.f32 %v610_v52, %v561_v23  ;;  %v373_v57 = vpop.f32.mrb[5].mxu0 }
  0xf8   : > { %v438_v58 = vmax.f32 %v428_v51, 0.0  ;;  %v444_v59 = vmax.f32 %v434_v53, 0.0  ;;  %v413_v60 = vmul.f32 %v561_v23, %v373_v57 }
  0xf9   : > { %450 = vst.msk [vmem:[%s803_s25 + $0x18] sm:$0xff] %vm446_vm1, %v439_v54  ;;  %456 = vst.msk [vmem:[%s803_s25 + $0x48] sm:$0xff] %vm446_vm1, %v445_v55  ;;  %v431_v61 = vadd.f32 %v562_v25, %v414_v56 }
  0xfa   : > { %449 = vst.msk [vmem:[%s803_s25 + $0x10] sm:$0xff] %vm446_vm1, %v438_v58  ;;  %455 = vst.msk [vmem:[%s803_s25 + $0x40] sm:$0xff] %vm446_vm1, %v444_v59  ;;  %v430_v62 = vadd.f32 %v562_v25, %v413_v60 }
  0xfb   : > { %v441_v63 = vmax.f32 %v431_v61, 0.0 }
  0xfc   : > { %v440_v0 = vmax.f32 %v430_v62, 0.0 }
  0xfd   : > { %452 = vst.msk [vmem:[%s803_s25 + $0x28] sm:$0xff] %vm446_vm1, %v441_v63 }
  0xfe   : > { %451 = vst.msk [vmem:[%s803_s25 + $0x20] sm:$0xff] %vm446_vm1, %v440_v0 }
  0xff PF: > { %s14_s17 = sadd.s32 1, %s690_s17   ;;  %s839_s15 = smov %s686_s16 }
 0x100   : > { %p11_p5 = scmp.ge.s32.totalorder %s14_s17, 4   ;;  %s840_s16 = smov %s842_s18 }
 0x102   :  { %13 = sbr.rel (!%p11_p5) target bundleno = 2 (0x2), region = 66 }

// kernel: down_forward.6
= control target key start
LH: loop header
LB: loop body
LE: loop exit
PB: predicated region body
PF: predicated region fallthrough
CT: control target
= control target key end

     0   :  { %s979_s12 = smov 0   ;;  %s981_s13 = smov 0   ;;  %s1105_s0 = inlined_call_operand.vmem [shape: f32[2,80,72], index: 0, kind: input, shape index: {}]   ;;  %s1106_s1 = inlined_call_operand.vmem [shape: f32[72,8], index: 1, kind: input, shape index: {}]   ;;  %s1107_s2 = inlined_call_operand.vmem [shape: f32[80,1], index: 2, kind: input, shape index: {}]   ;;  %s1108_s3 = inlined_call_operand.vmem [shape: f32[2,2,8], index: 3, kind: output, shape index: {}]  }
   0x1   :  { %s983_s14 = smov 0  }
   0x2 LB: > { %s25_s15 = sadd.s32 1, %s948_s13  ;;  %p715_p0 = scmp.ge.s32.totalorder %s952_s14, 1  ;;  %s952_s14 = sphi %s983_s14, %s13_s14   ;;  %s948_s13 = sphi %s981_s13, %s1110_s13   ;;  %s944_s12 = sphi %s979_s12, %s1109_s12  }
   0x3   : > { %p27_p1 = scmp.ge.s32.totalorder %s25_s15, 2  ;;  %p167_p2 = scmp.lt.s32.totalorder %s952_s14, 3 }
   0x5   : > { %s1112_s15 = smov (%p27_p1, %s25_s15), 0  ;;  %p168_p3 = pnand %p715_p0, %p167_p2 }
   0x6   : > { %v229_v0 = vld [vmem:[%s1106_s1] sm:$0xff] (!%p168_p3)  ;;  %v230_v1 = vld [vmem:[%s1106_s1 + $0x8] sm:$0xff] (!%p168_p3)  ;;  %v231_v2 = vld [vmem:[%s1106_s1 + $0x10] sm:$0xff] (!%p168_p3)  ;;  %p200_p4 = scmp.lt.s32.totalorder (!%p168_p3), %s944_s12, 1  ;;  %v954_v5 = vmov (!%p168_p3), 0   ;;  %vm238_vm0 = vcmask (!%p168_p3), 588800  }
   0x7   : > { %171 = sbr.rel (%p168_p3) target bundleno = 481 (0x1e1), region = 32  ;;  %v852_v3 = vpack.c.bf16 (!%p168_p3), %v230_v1, %v229_v0  ;;  %v232_v4 = vld [vmem:[%s1106_s1 + $0x18] sm:$0xff] (!%p168_p3)  ;;  %928 = vset.pattern.permute.xlu0 (!%p168_p3), %v954_v5  ;;  %929 = vset.pattern.permute.xlu1 (!%p168_p3), %v954_v5  ;;  %v233_v7 = vld [vmem:[%s1106_s1 + $0x20] sm:$0xff] (!%p168_p3)  ;;  %v234_v8 = vld [vmem:[%s1106_s1 + $0x28] sm:$0xff] (!%p168_p3)  ;;  %v955_v34 = vmov (!%p168_p3), 0.0|0.0   ;;  %vm956_vm1 = vmmov (!%p168_p3), 0  }
   0x8   : > { %v856_v6 = vpack.c.bf16 (!%p168_p3), %v232_v4, %v231_v2  ;;  %v384_v9 = vld [vmem:[%s1107_s2] sm:$0xff] (!%p168_p3)  ;;  %v386_v10 = vld [vmem:[%s1107_s2 + $0x10] sm:$0xff] (!%p168_p3)  ;;  %v860_v11 = vpack.c.bf16 (!%p168_p3), %v234_v8, %v233_v7  ;;  %v236_v13 = vld [vmem:[%s1106_s1 + $0x38] sm:$0xff] (!%p168_p3)  ;;  %868 = vmatprep.subr.bf16.mxu1 (!%p168_p3), %v955_v34  ;;  %v957_v35 = vmov (!%p168_p3), 0.0   ;;  %vm454_vm2 = vcmask (!%p168_p3), 654336  }
   0x9   : > { %853 = vmatprep.subr.bf16.mxu0 (!%p168_p3), %v852_v3  ;;  %396 = vperm.xlu0 (!%p168_p3), %928, %v384_v9   ;;  %v235_v12 = vld [vmem:[%s1106_s1 + $0x30] sm:$0xff] (!%p168_p3)  ;;  %v385_v14 = vld [vmem:[%s1107_s2 + $0x8] sm:$0xff] (!%p168_p3)  ;;  %v387_v16 = vld [vmem:[%s1107_s2 + $0x18] sm:$0xff] (!%p168_p3)  ;;  %vm611_vm3 = vcmask (!%p168_p3), 1040384   ;;  %vm617_vm4 = vcmask (!%p168_p3), 58368  }
   0xa   : > { %855 = vmatpush3.bf16.msra.mxu0 (!%p168_p3), %v852_v3  ;;  %406 = vperm.xlu1 (!%p168_p3), %929, %v386_v10   ;;  %v864_v17 = vpack.c.bf16 (!%p168_p3), %v236_v13, %v235_v12  ;;  %v388_v18 = vld [vmem:[%s1107_s2 + $0x20] sm:$0xff] (!%p168_p3)  ;;  %v389_v19 = vld [vmem:[%s1107_s2 + $0x28] sm:$0xff] (!%p168_p3)  ;;  %v390_v21 = vld [vmem:[%s1107_s2 + $0x30] sm:$0xff] (!%p168_p3) }
   0xb   : > { %857 = vmatprep.subr.bf16.mxu0 (!%p168_p3), %v856_v6  ;;  %v237_v20 = vld [vmem:[%s1106_s1 + $0x40] sm:$0xff] (!%p168_p3)  ;;  %v391_v22 = vld [vmem:[%s1107_s2 + $0x38] sm:$0xff] (!%p168_p3)  ;;  %v393_v26 = vld [vmem:[%s1107_s2 + $0x48] sm:$0xff] (!%p168_p3)  ;;  %826 = vmatprep.mubr.msk.f32.mxu1 (!%p168_p3), %vm956_vm1, %v957_v35 }
   0xc   : > { %v392_v24 = vld [vmem:[%s1107_s2 + $0x40] sm:$0xff] (!%p168_p3) }
   0xd   : > { %401 = vperm.xlu0 (!%p168_p3), %928, %v385_v14  }
   0xe   : > { %s1114_s12 = smov (!%p200_p4, %s944_s12), 1  ;;  %859 = vmatpush3.bf16.msra.mxu0 %v856_v6  ;;  %411 = vperm.xlu1 %929, %v387_v16  }
   0xf   : > { %s898_s5 = smul.u32 80, %s1114_s12  ;;  %861 = vmatprep.subr.bf16.mxu0 %v860_v11  ;;  %s717_s8 = sshll.u32 %s1114_s12, 1 }
  0x10   : > { %s218_s11 = scalar_lea.vmem %s1108_s3, %s717_s8 }
  0x11   : > { %s1033_s16 = scalar_lea.vmem %s1105_s0, %s898_s5  ;;  %416 = vperm.xlu0 %928, %v388_v18  }
  0x12   : > { %v219_v15 = vld [vmem:[%s1033_s16] sm:$0xff]  ;;  %863 = vmatpush3.bf16.msra.mxu0 %v860_v11  ;;  %421 = vperm.xlu1 %929, %v389_v19   ;;  %v220_v23 = vld [vmem:[%s1033_s16 + $0x8] sm:$0xff]  ;;  %v221_v25 = vld [vmem:[%s1033_s16 + $0x10] sm:$0xff] }
  0x13   : > { %791 = vmatprep.mubr.msk.f32.mxu0 %vm238_vm0, %v219_v15  ;;  %865 = vmatprep.subr.bf16.mxu0 %v864_v17  ;;  %v222_v27 = vld [vmem:[%s1033_s16 + $0x18] sm:$0xff]  ;;  %v223_v28 = vld [vmem:[%s1033_s16 + $0x20] sm:$0xff]  ;;  %v224_v29 = vld [vmem:[%s1033_s16 + $0x28] sm:$0xff] }
  0x14   : > { %v225_v30 = vld [vmem:[%s1033_s16 + $0x30] sm:$0xff]  ;;  %v226_v31 = vld [vmem:[%s1033_s16 + $0x38] sm:$0xff]  ;;  %v227_v32 = vld [vmem:[%s1033_s16 + $0x40] sm:$0xff] }
  0x15   : > { %426 = vperm.xlu0 %928, %v390_v21   ;;  %v228_v33 = vld [vmem:[%s1033_s16 + $0x48] sm:$0xff] }
  0x16   : > { %867 = vmatpush3.bf16.msra.mxu0 %v864_v17  ;;  %431 = vperm.xlu1 %929, %v391_v22   ;;  %v958_v22 = vmov 1.0  }
  0x17   : > { %789 = vmatprep.subr.mxu0 %v237_v20 }
  0x19   : > { %436 = vperm.xlu0 %928, %v392_v24  }
  0x1a   : > { %790 = vmatpush3.msra.mxu0 %v237_v20  ;;  %441 = vperm.xlu1 %929, %v393_v26  }
  0x1b   : > { %792 = vmatmul.mubr.msk.f32.vlgmr.msra.gmra.mrb[0].mxu0 %vm238_vm0, %v220_v23  ;;  %883 = vmatprep.subr.bf16.mxu0 %v955_v34 }
  0x1c   : > { %794 = vmatprep.mubr.msk.f32.mxu0 %vm238_vm0, %v221_v25 }
  0x1f   : > { %795 = vmatmul.mubr.msk.f32.gmra.mrb[2].mxu0 %vm238_vm0, %v222_v27 }
  0x20   : > { %797 = vmatprep.mubr.msk.f32.mxu0 %vm238_vm0, %v223_v28 }
  0x23   : > { %798 = vmatmul.mubr.msk.f32.gmra.mrb[4].mxu0 %vm238_vm0, %v224_v29 }
  0x24   : > { %800 = vmatprep.mubr.msk.f32.mxu0 %vm238_vm0, %v225_v30 }
  0x27   : > { %801 = vmatmul.mubr.msk.f32.gmra.mrb[6].mxu0 %vm238_vm0, %v226_v31 }
  0x28   : > { %803 = vmatprep.mubr.msk.f32.mxu0 %vm238_vm0, %v227_v32 }
  0x2b   : > { %804 = vmatmul.mubr.msk.f32.gmra.mrb[8].mxu0 %vm238_vm0, %v228_v33 }
  0x2c   : > { %849 = vmatprep.mubr.msk.f32.mxu0 %vm956_vm1, %v957_v35 }
  0x88   : > { %v397_v37 = vpop.permute.xlu0 %396 }
  0x89   : > { %v407_v36 = vpop.permute.xlu1 %406 }
  0x8c   : > { %v402_v39 = vpop.permute.xlu0 %401 }
  0x8d   : > { %v412_v38 = vpop.permute.xlu1 %411 }
  0x90   : > { %v417_v49 = vpop.permute.xlu0 %416 }
  0x91   : > { %v422_v45 = vpop.permute.xlu1 %421 }
  0x94   : > { %v427_v63 = vpop.permute.xlu0 %426 }
  0x95   : > { %v432_v60 = vpop.permute.xlu1 %431 }
  0x98   : > { %v437_v13 = vpop.permute.xlu0 %436 }
  0x99   : > { %v442_v9 = vpop.permute.xlu1 %441 }
  0xee   : > { %v793_v40 = vpop.f32.mrb[0].mxu0 }
  0xef   : > { %v445_v41 = vmul.f32 %v793_v40, %v402_v39  ;;  %v335_v42 = vpop.f32.mrb[1].mxu0 }
  0xf0   : > { %v444_v43 = vmul.f32 %v397_v37, %v335_v42 }
  0xf1   : > { %v529_v44 = vmul.f32 %v445_v41, %v445_v41 }
  0xf2   : > { %v528_v46 = vmul.f32 %v444_v43, %v444_v43  ;;  %v796_v47 = vpop.f32.mrb[2].mxu0  ;;  %v869_v48 = vpack.c.bf16 %v445_v41, %v444_v43 }
  0xf3   : > { %v447_v50 = vmul.f32 %v796_v47, %v412_v38  ;;  %v345_v51 = vpop.f32.mrb[3].mxu0 }
  0xf4   : > { %v884_v52 = vpack.c.bf16 %v529_v44, %v528_v46  ;;  %v446_v53 = vmul.f32 %v407_v36, %v345_v51  ;;  %870 = vmatpush3.bf16.msra.mxu1 %v869_v48 }
  0xf5   : > { %v531_v54 = vmul.f32 %v447_v50, %v447_v50  ;;  %871 = vmatprep.subr.bf16.mxu1 %v955_v34 }
  0xf6   : > { %v872_v55 = vpack.c.bf16 %v447_v50, %v446_v53  ;;  %v530_v56 = vmul.f32 %v446_v53, %v446_v53  ;;  %v799_v57 = vpop.f32.mrb[4].mxu0  ;;  %885 = vmatpush3.bf16.msra.mxu0 %v884_v52 }
  0xf7   : > { %v449_v58 = vmul.f32 %v799_v57, %v422_v45  ;;  %v355_v59 = vpop.f32.mrb[5].mxu0  ;;  %886 = vmatprep.subr.bf16.mxu0 %v955_v34 }
  0xf8   : > { %v887_v61 = vpack.c.bf16 %v531_v54, %v530_v56  ;;  %v448_v62 = vmul.f32 %v417_v49, %v355_v59  ;;  %873 = vmatpush3.bf16.msra.mxu1 %v872_v55 }
  0xf9   : > { %v533_v0 = vmul.f32 %v449_v58, %v449_v58  ;;  %874 = vmatprep.subr.bf16.mxu1 %v955_v34 }
  0xfa   : > { %v875_v1 = vpack.c.bf16 %v449_v58, %v448_v62  ;;  %v532_v2 = vmul.f32 %v448_v62, %v448_v62  ;;  %v802_v3 = vpop.f32.mrb[6].mxu0  ;;  %888 = vmatpush3.bf16.msra.mxu0 %v887_v61 }
  0xfb   : > { %v451_v4 = vmul.f32 %v802_v3, %v432_v60  ;;  %v365_v5 = vpop.f32.mrb[7].mxu0  ;;  %889 = vmatprep.subr.bf16.mxu0 %v955_v34 }
  0xfc   : > { %v890_v6 = vpack.c.bf16 %v533_v0, %v532_v2  ;;  %v450_v7 = vmul.f32 %v427_v63, %v365_v5  ;;  %876 = vmatpush3.bf16.msra.mxu1 %v875_v1 }
  0xfd   : > { %v535_v8 = vmul.f32 %v451_v4, %v451_v4  ;;  %877 = vmatprep.subr.bf16.mxu1 %v955_v34 }
  0xfe   : > { %v878_v10 = vpack.c.bf16 %v451_v4, %v450_v7  ;;  %v534_v11 = vmul.f32 %v450_v7, %v450_v7  ;;  %v805_v12 = vpop.f32.mrb[8].mxu0  ;;  %891 = vmatpush3.bf16.msra.mxu0 %v890_v6 }
  0xff   : > { %v453_v14 = vmul.f32 %v805_v12, %v442_v9  ;;  %v375_v15 = vpop.f32.mrb[9].mxu0  ;;  %892 = vmatprep.subr.bf16.mxu0 %v955_v34 }
 0x100   : > { %v893_v16 = vpack.c.bf16 %v535_v8, %v534_v11  ;;  %v452_v17 = vmul.f32 %v437_v13, %v375_v15  ;;  %879 = vmatpush3.bf16.msra.mxu1 %v878_v10 }
 0x101   : > { %v537_v18 = vmul.f32 %v453_v14, %v453_v14  ;;  %880 = vmatprep.subr.bf16.mxu1 %v955_v34 }
 0x102   : > { %v881_v19 = vpack.c.bf16 %v453_v14, %v452_v17  ;;  %v536_v20 = vmul.f32 %v452_v17, %v452_v17  ;;  %894 = vmatpush3.bf16.msra.mxu0 %v893_v16 }
 0x103   : > { %895 = vmatprep.subr.bf16.mxu0 %v955_v34 }
 0x104   : > { %v896_v21 = vpack.c.bf16 %v537_v18, %v536_v20  ;;  %882 = vmatpush3.bf16.msra.mxu1 %v881_v19 }
 0x106   : > { %897 = vmatpush3.bf16.msra.mxu0 %v896_v21 }
 0x107   : > { %827 = vmatmul.mubr.msk.f32.vlgmr.msra.gmra.mrb[0].mxu1 %vm454_vm2, %v958_v22 }
 0x109   : > { %850 = vmatmul.mubr.msk.f32.vlgmr.msra.gmra.mrb[10].mxu0 %vm454_vm2, %v958_v22 }
 0x1da   : > { %v524_v23 = vpop.f32.mrb[0].mxu1 }
 0x1db   : > { %v828_v24 = vpop.f32.mrb[1].mxu1 }
 0x1dc   : > { %v604_v25 = vpop.f32.mrb[10].mxu0 }
 0x1dd   : > { %v609_v26 = vrot.slane %v604_v25, 7  ;;  %v851_v27 = vpop.f32.mrb[11].mxu0 }
 0x1df   : > { %v612_v28 = vsel %vm611_vm3, %v524_v23, %v609_v26 }
 0x1e0   : > { %618 = vst.msk [vmem:[%s218_s11] sm:$0x3] %vm617_vm4, %v612_v28 }
 0x1e1 PF: > { %s13_s14 = sadd.s32 1, %s952_s14   ;;  %s1109_s12 = smov %s948_s13 }
 0x1e2   : > { %p10_p5 = scmp.ge.s32.totalorder %s13_s14, 4   ;;  %s1110_s13 = smov %s1112_s15 }
 0x1e4   :  { %12 = sbr.rel (!%p10_p5) target bundleno = 2 (0x2), region = 73 }

</bundles_post_ra>
